<compile_context>
chip_gen: v7x
topology: tpu7x:2x2x1
jax: 0.10.0
libtpu: 0.0.40
codegen_flags: <defaults>
</compile_context>

<pallas_src>
import jax
import jax.numpy as jnp
from jax.experimental import pallas as pl
from jax.experimental.pallas import tpu as pltpu


LANE = 128          # pad the tiny num_classes output to a lane-dense width
BATCH_ALIGN = 16    # bf16 intermediates want 16-row alignment on the batch dim


def _round_up(n, m):
    return (n + m - 1) // m * m


def _choose_batch_tile(B, block_b, max_waste_frac=0.10):
    """Batch tile: multiple of 16, <= block_b, padding waste <= ~10% when
    possible, preferring even tile counts (v7x megacore balance) then the
    largest tile."""
    b16 = _round_up(B, BATCH_ALIGN)
    if b16 <= block_b:
        return b16                          # whole batch in a single tile
    budget = max(int(B * max_waste_frac), BATCH_ALIGN)
    candidates = []
    for tb in range(256, block_b + 1, BATCH_ALIGN):
        bp = _round_up(B, tb)
        pad = bp - B
        over = pad > budget
        candidates.append((over, pad if over else 0, (bp // tb) % 2, -tb, tb))
    return min(candidates)[-1]


def mlp_kernel(x_ref, w1_ref, b1_ref, w2_ref, b2_ref, w3_ref, b3_ref, o_ref):
    # x arrives f32 from HBM (4 B/elem, single touch); cast to bf16 on the VPU
    # so the MXU runs its native bf16 path with f32 accumulation.
    x = x_ref[...].astype(jnp.bfloat16)
    # Layer 1: [TB,768]bf16 @ [768,512]bf16 -> f32 acc, + bias, ReLU
    h1 = jnp.dot(x, w1_ref[...], preferred_element_type=jnp.float32)
    h1 = jnp.maximum(h1 + b1_ref[...], 0.0).astype(jnp.bfloat16)
    # (Dropout p=0.3 -> identity in eval mode)
    # Layer 2: [TB,512]bf16 @ [512,256]bf16 -> f32 acc, + bias, ReLU
    h2 = jnp.dot(h1, w2_ref[...], preferred_element_type=jnp.float32)
    h2 = jnp.maximum(h2 + b2_ref[...], 0.0).astype(jnp.bfloat16)
    # (Dropout p=0.3 -> identity in eval mode)
    # Layer 3: [TB,256]bf16 @ [256,128]bf16 (zero-padded classes) + bias.
    # 128-lane output -> unmasked, lane-dense stores.
    o_ref[...] = (
        jnp.dot(h2, w3_ref[...], preferred_element_type=jnp.float32) + b3_ref[...]
    )


def prepare_params(params):
    """One-time parameter prep, hoisted out of the per-call forward path:
    bf16 weight casts + zero-padding of the classifier to 128 output lanes."""
    w1, b1, w2, b2, w3, b3 = params
    h2_dim, num_classes = w3.shape
    w3p = jnp.zeros((h2_dim, LANE), jnp.float32).at[:, :num_classes].set(w3)
    b3p = jnp.zeros((1, LANE), jnp.float32).at[:, :num_classes].set(b3)
    return (
        w1.astype(jnp.bfloat16),
        b1,
        w2.astype(jnp.bfloat16),
        b2,
        w3p.astype(jnp.bfloat16),
        b3p,
    )


def mlp_forward(x, prepared_params, *, num_classes=2, block_b=1024):
    """Forward pass. x: [B, input_size] f32, prepared_params from
    prepare_params(). Returns [B, num_classes] f32 logits."""
    w1b, b1, w2b, b2, w3b, b3p = prepared_params
    B, F = x.shape
    h1_dim = w1b.shape[1]
    h2_dim = w2b.shape[1]

    tb = _choose_batch_tile(B, block_b)
    bp = _round_up(B, tb)
    # Only materialize a padded copy of x when the tile doesn't divide B.
    xp = x if bp == B else jnp.pad(x, ((0, bp - B), (0, 0)))

    grid = (bp // tb,)
    const_block = lambda i: (0, 0)  # weights/biases: same block every step -> VMEM-resident
    # TODO(synk): weight BlockSpecs could use pipeline_mode=pl.Buffered(1) to
    # drop their unused second buffer (~1 MiB); kept default for robustness.

    out = pl.pallas_call(
        mlp_kernel,
        out_shape=jax.ShapeDtypeStruct((bp, LANE), jnp.float32),
        grid=grid,
        in_specs=[
            pl.BlockSpec((tb, F), lambda i: (i, 0)),        # x tile (pipelined, f32)
            pl.BlockSpec((F, h1_dim), const_block),          # w1 (bf16)
            pl.BlockSpec((1, h1_dim), const_block),          # b1
            pl.BlockSpec((h1_dim, h2_dim), const_block),     # w2 (bf16)
            pl.BlockSpec((1, h2_dim), const_block),          # b2
            pl.BlockSpec((h2_dim, LANE), const_block),       # w3 (bf16, padded)
            pl.BlockSpec((1, LANE), const_block),            # b3 (padded)
        ],
        out_specs=pl.BlockSpec((tb, LANE), lambda i: (i, 0)),
        compiler_params=pltpu.CompilerParams(
            # Batch tiles are independent -> megacore-shardable on v7x.
            dimension_semantics=("parallel",),
            # ~15 MiB actual footprint at tb=1024; leave headroom on v7x's
            # 64 MiB physical VMEM instead of claiming all of it.
            vmem_limit_bytes=32 * 1024 * 1024,
        ),
    )(xp, w1b, b1, w2b, b2, w3b, b3p)

    return out[:B, :num_classes]


def init_params(key, input_size=768, num_classes=2):
    """Deterministic init mirroring PyTorch nn.Linear default (uniform +-1/sqrt(fan_in))."""
    dims = [(input_size, 512), (512, 256), (256, num_classes)]
    params = []
    for fan_in, fan_out in dims:
        kw, kb, key = jax.random.split(key, 3)
        bound = 1.0 / jnp.sqrt(fan_in)
        w = jax.random.uniform(kw, (fan_in, fan_out), jnp.float32, -bound, bound)
        b = jax.random.uniform(kb, (1, fan_out), jnp.float32, -bound, bound)
        params += [w, b]
    return params


if __name__ == "__main__":
    key = jax.random.PRNGKey(0)
    kx, kp = jax.random.split(key)

    B, INPUT_SIZE, NUM_CLASSES = 8, 768, 2
    x = jax.random.normal(kx, (B, INPUT_SIZE), dtype=jnp.float32)
    params = init_params(kp, INPUT_SIZE, NUM_CLASSES)

    # One-time prep (outside the jitted forward; would live next to model init).
    prep = jax.block_until_ready(prepare_params(params))

    fwd = jax.jit(mlp_forward)
    out = jax.block_until_ready(fwd(x, prep))
    assert out.shape == (B, NUM_CLASSES)

    w1, b1, w2, b2, w3, b3 = params

    # Reference 1: same bf16-input / f32-accumulate math as the kernel (tight).
    xb = x.astype(jnp.bfloat16)
    r1 = jnp.maximum(
        jnp.dot(xb, w1.astype(jnp.bfloat16), preferred_element_type=jnp.float32) + b1,
        0.0,
    ).astype(jnp.bfloat16)
    r2 = jnp.maximum(
        jnp.dot(r1, w2.astype(jnp.bfloat16), preferred_element_type=jnp.float32) + b2,
        0.0,
    ).astype(jnp.bfloat16)
    ref_bf16 = (
        jnp.dot(r2, w3.astype(jnp.bfloat16), preferred_element_type=jnp.float32) + b3
    )
    assert jnp.allclose(out, ref_bf16, atol=2e-3, rtol=2e-3)

    # Reference 2: full-f32 PyTorch-equivalent math (loose; bounds bf16 error).
    h1 = jnp.maximum(x @ w1 + b1, 0.0)
    h2 = jnp.maximum(h1 @ w2 + b2, 0.0)
    ref_f32 = h2 @ w3 + b3
    assert jnp.allclose(out, ref_f32, atol=5e-2, rtol=5e-2)

    print("KERNEL_OK")
</pallas_src>

<mosaic_0001>
module attributes {stable_mosaic.version = 11 : i64} {
  func.func @mlp_kernel(%arg0: i32, %arg1: memref<16x768xf32, #tpu.memory_space<vmem>>, %arg2: memref<768x512xbf16, #tpu.memory_space<vmem>>, %arg3: memref<1x512xf32, #tpu.memory_space<vmem>>, %arg4: memref<512x256xbf16, #tpu.memory_space<vmem>>, %arg5: memref<1x256xf32, #tpu.memory_space<vmem>>, %arg6: memref<256x128xbf16, #tpu.memory_space<vmem>>, %arg7: memref<1x128xf32, #tpu.memory_space<vmem>>, %arg8: memref<16x128xf32, #tpu.memory_space<vmem>>) attributes {dimension_semantics = [#tpu.dimension_semantics<parallel>], iteration_bounds = array<i64: 1>, scalar_prefetch = 0 : i64, scratch_operands = 0 : i64, tpu.core_type = #tpu.core_type<tc>, window_params = [{transform_indices = @transform_0, window_bounds = array<i64: 16, 768>}, {pipeline_mode = #tpu.pipeline_mode<synchronous>, transform_indices = @transform_1, window_bounds = array<i64: 768, 512>}, {pipeline_mode = #tpu.pipeline_mode<synchronous>, transform_indices = @transform_2, window_bounds = array<i64: 1, 512>}, {pipeline_mode = #tpu.pipeline_mode<synchronous>, transform_indices = @transform_3, window_bounds = array<i64: 512, 256>}, {pipeline_mode = #tpu.pipeline_mode<synchronous>, transform_indices = @transform_4, window_bounds = array<i64: 1, 256>}, {pipeline_mode = #tpu.pipeline_mode<synchronous>, transform_indices = @transform_5, window_bounds = array<i64: 256, 128>}, {pipeline_mode = #tpu.pipeline_mode<synchronous>, transform_indices = @transform_6, window_bounds = array<i64: 1, 128>}, {transform_indices = @transform_7, window_bounds = array<i64: 16, 128>}]} {
    %c0 = arith.constant 0 : index
    %c0_0 = arith.constant 0 : index
    %0 = vector.load %arg1[%c0, %c0_0] : memref<16x768xf32, #tpu.memory_space<vmem>>, vector<16x768xf32>
    %1 = arith.truncf %0 : vector<16x768xf32> to vector<16x768xbf16>
    %c0_1 = arith.constant 0 : index
    %c0_2 = arith.constant 0 : index
    %2 = vector.load %arg2[%c0_1, %c0_2] : memref<768x512xbf16, #tpu.memory_space<vmem>>, vector<768x512xbf16>
    %cst = arith.constant dense<0.000000e+00> : vector<16x512xf32>
    %3 = tpu.matmul %1, %2, %cst {dimension_numbers = #tpu.dot_dimension_numbers<[1], [0], [0], [1], [0, 0, 1, 1], [], []>} : vector<16x768xbf16>, vector<768x512xbf16>, vector<16x512xf32> -> vector<16x512xf32>
    %c0_3 = arith.constant 0 : index
    %c0_4 = arith.constant 0 : index
    %4 = vector.load %arg3[%c0_3, %c0_4] : memref<1x512xf32, #tpu.memory_space<vmem>>, vector<1x512xf32>
    %5 = vector.broadcast %4 : vector<1x512xf32> to vector<16x512xf32>
    %6 = arith.addf %3, %5 : vector<16x512xf32>
    %cst_5 = arith.constant 0.000000e+00 : f32
    %7 = vector.broadcast %cst_5 : f32 to vector<16x512xf32>
    %8 = arith.maximumf %6, %7 : vector<16x512xf32>
    %9 = arith.truncf %8 : vector<16x512xf32> to vector<16x512xbf16>
    %c0_6 = arith.constant 0 : index
    %c0_7 = arith.constant 0 : index
    %10 = vector.load %arg4[%c0_6, %c0_7] : memref<512x256xbf16, #tpu.memory_space<vmem>>, vector<512x256xbf16>
    %cst_8 = arith.constant dense<0.000000e+00> : vector<16x256xf32>
    %11 = tpu.matmul %9, %10, %cst_8 {dimension_numbers = #tpu.dot_dimension_numbers<[1], [0], [0], [1], [0, 0, 1, 1], [], []>} : vector<16x512xbf16>, vector<512x256xbf16>, vector<16x256xf32> -> vector<16x256xf32>
    %c0_9 = arith.constant 0 : index
    %c0_10 = arith.constant 0 : index
    %12 = vector.load %arg5[%c0_9, %c0_10] : memref<1x256xf32, #tpu.memory_space<vmem>>, vector<1x256xf32>
    %13 = vector.broadcast %12 : vector<1x256xf32> to vector<16x256xf32>
    %14 = arith.addf %11, %13 : vector<16x256xf32>
    %cst_11 = arith.constant 0.000000e+00 : f32
    %15 = vector.broadcast %cst_11 : f32 to vector<16x256xf32>
    %16 = arith.maximumf %14, %15 : vector<16x256xf32>
    %17 = arith.truncf %16 : vector<16x256xf32> to vector<16x256xbf16>
    %c0_12 = arith.constant 0 : index
    %c0_13 = arith.constant 0 : index
    %18 = vector.load %arg6[%c0_12, %c0_13] : memref<256x128xbf16, #tpu.memory_space<vmem>>, vector<256x128xbf16>
    %cst_14 = arith.constant dense<0.000000e+00> : vector<16x128xf32>
    %19 = tpu.matmul %17, %18, %cst_14 {dimension_numbers = #tpu.dot_dimension_numbers<[1], [0], [0], [1], [0, 0, 1, 1], [], []>} : vector<16x256xbf16>, vector<256x128xbf16>, vector<16x128xf32> -> vector<16x128xf32>
    %c0_15 = arith.constant 0 : index
    %c0_16 = arith.constant 0 : index
    %20 = vector.load %arg7[%c0_15, %c0_16] : memref<1x128xf32, #tpu.memory_space<vmem>>, vector<1x128xf32>
    %21 = vector.broadcast %20 : vector<1x128xf32> to vector<16x128xf32>
    %22 = arith.addf %19, %21 : vector<16x128xf32>
    %c0_17 = arith.constant 0 : index
    %c0_18 = arith.constant 0 : index
    %23 = vector.load %arg8[%c0_17, %c0_18] : memref<16x128xf32, #tpu.memory_space<vmem>>, vector<16x128xf32>
    tpu.vector_store %arg8[%c0_17, %c0_18], %22 {strides = array<i32>} : memref<16x128xf32, #tpu.memory_space<vmem>>, vector<16x128xf32>,
    return
  }
  func.func @transform_0(%arg0: i32) -> (i32, i32) {
    %c0_i32 = arith.constant 0 : i32
    %c0_i32_0 = arith.constant 0 : i32
    return %arg0, %c0_i32 : i32, i32
  }
  func.func @transform_1(%arg0: i32) -> (i32, i32) {
    %c0_i32 = arith.constant 0 : i32
    %c0_i32_0 = arith.constant 0 : i32
    %c0_i32_1 = arith.constant 0 : i32
    return %c0_i32, %c0_i32_0 : i32, i32
  }
  func.func @transform_2(%arg0: i32) -> (i32, i32) {
    %c0_i32 = arith.constant 0 : i32
    %c0_i32_0 = arith.constant 0 : i32
    %c0_i32_1 = arith.constant 0 : i32
    return %c0_i32, %c0_i32_0 : i32, i32
  }
  func.func @transform_3(%arg0: i32) -> (i32, i32) {
    %c0_i32 = arith.constant 0 : i32
    %c0_i32_0 = arith.constant 0 : i32
    %c0_i32_1 = arith.constant 0 : i32
    return %c0_i32, %c0_i32_0 : i32, i32
  }
  func.func @transform_4(%arg0: i32) -> (i32, i32) {
    %c0_i32 = arith.constant 0 : i32
    %c0_i32_0 = arith.constant 0 : i32
    %c0_i32_1 = arith.constant 0 : i32
    return %c0_i32, %c0_i32_0 : i32, i32
  }
  func.func @transform_5(%arg0: i32) -> (i32, i32) {
    %c0_i32 = arith.constant 0 : i32
    %c0_i32_0 = arith.constant 0 : i32
    %c0_i32_1 = arith.constant 0 : i32
    return %c0_i32, %c0_i32_0 : i32, i32
  }
  func.func @transform_6(%arg0: i32) -> (i32, i32) {
    %c0_i32 = arith.constant 0 : i32
    %c0_i32_0 = arith.constant 0 : i32
    %c0_i32_1 = arith.constant 0 : i32
    return %c0_i32, %c0_i32_0 : i32, i32
  }
  func.func @transform_7(%arg0: i32) -> (i32, i32) {
    %c0_i32 = arith.constant 0 : i32
    %c0_i32_0 = arith.constant 0 : i32
    return %arg0, %c0_i32 : i32, i32
  }
}

</mosaic_0001>

<bundles_post_ra>
// kernel: mlp_forward.1
= control target key start
LH: loop header
LB: loop body
LE: loop exit
PB: predicated region body
PF: predicated region fallthrough
CT: control target
= control target key end

     0   :  { %12 = vsyncpa [#allocation3], 0  ;;  %s3183_s0 = inlined_call_operand.vmem [shape: f32[16,768], index: 0, kind: input, shape index: {}]   ;;  %s3184_s1 = inlined_call_operand.hbm [shape: bf16[768,512], index: 1, kind: input, shape index: {}]   ;;  %s3185_s2 = inlined_call_operand.vmem [shape: f32[1,512], index: 2, kind: input, shape index: {}]   ;;  %s3186_s3 = inlined_call_operand.hbm [shape: bf16[512,256], index: 3, kind: input, shape index: {}]   ;;  %s3187_s4 = inlined_call_operand.vmem [shape: f32[1,256], index: 4, kind: input, shape index: {}]   ;;  %s3188_s5 = inlined_call_operand.vmem [shape: bf16[256,128], index: 5, kind: input, shape index: {}]   ;;  %s3189_s6 = inlined_call_operand.vmem [shape: f32[1,128], index: 6, kind: input, shape index: {}]   ;;  %s3190_s7 = inlined_call_operand.vmem [shape: f32[16,128], index: 7, kind: output, shape index: {}]  }
   0x1   :  { %13 = vsyncpa [#allocation5], 0  ;;  %s2970_s24 = smov [#allocation2]   ;;  %s2922_s28 = scalar_lea.hbm %s3184_s1, 24576 }
   0x2   :  { %s21_s25 = sshll.u32 %s2970_s24, 4  ;;  %p2923_p0 = scmp.ne.s32.totalorder %s3184_s1, %s2922_s28  ;;  %s22_s25 = int_to_ptr.vmem [resolvable:$true] %s21_s25 }
   0x3   :  { %p2926_p1 = scmp.lt.u32.totalorder %s2922_s28, %s3184_s1 }
   0x5   :  { %p2928_p2 = pnand %p2926_p1, %p2923_p0 }
   0x7   :  { %2931 = shalt.err (!%p2928_p2)
}
   0x8   :  { %s2932_s10 = scalar_lea.vmem %s22_s25, 24576  ;;  %p2937_p4 = scmp.lt.s32.totalorder %s22_s25, %s22_s25 }
   0x9   :  { %p2933_p3 = scmp.ne.s32.totalorder %s22_s25, %s2932_s10  ;;  %p2938_p5 = scmp.lt.s32.totalorder %s2932_s10, %s2932_s10 }
   0xb   :  { %p2939_p6 = por %p2938_p5, %p2937_p4 }
   0xd   :  { %p2940_p7 = pnand %p2939_p6, %p2933_p3 }
   0xf   :  { %2943 = shalt.err (!%p2940_p7)
}
  0x10   :  { %s2971_s11 = smov 256   ;;  %s2972_s12 = smov 16  }
  0x11   :  { %27 = dma.hbm_to_vmem [thread:$0]  %s3184_s1, 24576, %s22_s25, [#allocation3], %s2971_s11, %s2971_s11, %s2972_s12  }
  0x12   :  { %s2973_s15 = smov [#allocation4]   ;;  %s2944_s19 = scalar_lea.hbm %s3186_s3, 8192 }
  0x13   :  { %s35_s16 = sshll.u32 %s2973_s15, 4  ;;  %p2945_p8 = scmp.ne.s32.totalorder %s3186_s3, %s2944_s19  ;;  %s36_s16 = int_to_ptr.vmem [resolvable:$true] %s35_s16 }
  0x14   :  { %p2948_p9 = scmp.lt.u32.totalorder %s2944_s19, %s3186_s3 }
  0x16   :  { %p2950_p10 = pnand %p2948_p9, %p2945_p8 }
  0x18   :  { %2953 = shalt.err (!%p2950_p10)
}
  0x19   :  { %s2954_s24 = scalar_lea.vmem %s36_s16, 8192  ;;  %p2959_p12 = scmp.lt.s32.totalorder %s36_s16, %s36_s16 }
  0x1a   :  { %p2955_p11 = scmp.ne.s32.totalorder %s36_s16, %s2954_s24  ;;  %p2960_p13 = scmp.lt.s32.totalorder %s2954_s24, %s2954_s24 }
  0x1c   :  { %p2961_p0 = por %p2960_p13, %p2959_p12 }
  0x1e   :  { %p2962_p1 = pnand %p2961_p0, %p2955_p11 }
  0x20   :  { %2965 = shalt.err (!%p2962_p1)
}
  0x21   :  { %s2974_s1 = smov 128   ;;  %s2975_s25 = smov 8  }
  0x22   :  { %41 = dma.hbm_to_vmem [thread:$0]  %s3186_s3, 8192, %s36_s16, [#allocation5], %s2974_s1, %s2974_s1, %s2975_s25  }
  0x23   :  { %2966 = dma.done.wait [#allocation3], 24576  }
  0x24   :  { %2967 = vsyncadd [#allocation3], 4294942720 }
  0x25   :  { %2968 = dma.done.wait [#allocation5], 8192  }
  0x26   :  { %2969 = vsyncadd [#allocation5], 4294959104  ;;  %v2522_v0 = vld [vmem:[#allocation2 + $0x4] ss:$16 sps:$4 sm:$0xff]   ;;  %v2526_v2 = vld [vmem:[#allocation2] ss:$16 sps:$4 sm:$0xff]  }
  0x27   :  { %v2524_v1 = vld [vmem:[#allocation2 + $0x204] ss:$16 sps:$4 sm:$0xff]   ;;  %1247 = vmatprep.subr.bf16.mxu1 %v2522_v0  ;;  %v2527_v3 = vld [vmem:[#allocation2 + $0x200] ss:$16 sps:$4 sm:$0xff]   ;;  %v56_v46 = vld [vmem:[%s3183_s0 + $0x8] sm:$0xff] }
  0x28   :  { %1290 = vmatprep.subr.bf16.mxu0 %v2524_v1  ;;  %v2528_v4 = vld [vmem:[#allocation2 + $0x24] ss:$16 sps:$4 sm:$0xff]   ;;  %1248 = vmatpush1.bf16.msra.mxu1 %v2526_v2  ;;  %v2532_v6 = vld [vmem:[#allocation2 + $0x20] ss:$16 sps:$4 sm:$0xff]   ;;  %v62_v49 = vld [vmem:[%s3183_s0 + $0x38] sm:$0xff] }
  0x29   :  { %1291 = vmatpush1.bf16.msra.mxu0 %v2527_v3  ;;  %v2530_v5 = vld [vmem:[#allocation2 + $0x224] ss:$16 sps:$4 sm:$0xff]   ;;  %1249 = vmatprep.subr.bf16.mxu1 %v2528_v4  ;;  %v2533_v7 = vld [vmem:[#allocation2 + $0x220] ss:$16 sps:$4 sm:$0xff]   ;;  %v3046_v50 = vpack.c.bf16 %v62_v49, %v56_v46  ;;  %v58_v51 = vld [vmem:[%s3183_s0 + $0x18] sm:$0xff] }
  0x2a   :  { %1292 = vmatprep.subr.bf16.mxu0 %v2530_v5  ;;  %v2534_v8 = vld [vmem:[#allocation2 + $0x44] ss:$16 sps:$4 sm:$0xff]   ;;  %v2538_v10 = vld [vmem:[#allocation2 + $0x40] ss:$16 sps:$4 sm:$0xff]   ;;  %v64_v52 = vld [vmem:[%s3183_s0 + $0x48] sm:$0xff] }
  0x2b   :  { %v2536_v9 = vld [vmem:[#allocation2 + $0x244] ss:$16 sps:$4 sm:$0xff]   ;;  %v2539_v11 = vld [vmem:[#allocation2 + $0x240] ss:$16 sps:$4 sm:$0xff]   ;;  %v3054_v55 = vpack.c.bf16 %v64_v52, %v58_v51  ;;  %1279 = vmatprep.mubr.bf16.mxu1 %v3046_v50  ;;  %v2663_v46 = vld [vmem:[#allocation2 + $0xe8] ss:$16 sps:$4 sm:$0xff]  }
  0x2c   :  { %1250 = vmatpush1.bf16.msra.mxu1 %v2532_v6  ;;  %v2540_v12 = vld [vmem:[#allocation2 + $0x64] ss:$16 sps:$4 sm:$0xff]   ;;  %v2544_v14 = vld [vmem:[#allocation2 + $0x60] ss:$16 sps:$4 sm:$0xff]   ;;  %v2677_v52 = vld [vmem:[#allocation2 + $0x12c] ss:$16 sps:$4 sm:$0xff]  }
  0x2d   :  { %1293 = vmatpush1.bf16.msra.mxu0 %v2533_v7  ;;  %1251 = vmatprep.subr.bf16.mxu1 %v2534_v8  ;;  %v2542_v13 = vld [vmem:[#allocation2 + $0x264] ss:$16 sps:$4 sm:$0xff]   ;;  %v2545_v15 = vld [vmem:[#allocation2 + $0x260] ss:$16 sps:$4 sm:$0xff]  }
  0x2e   :  { %1294 = vmatprep.subr.bf16.mxu0 %v2536_v9  ;;  %v2546_v16 = vld [vmem:[#allocation2 + $0x84] ss:$16 sps:$4 sm:$0xff]   ;;  %v2550_v18 = vld [vmem:[#allocation2 + $0x80] ss:$16 sps:$4 sm:$0xff]   ;;  %1322 = vmatprep.mubr.bf16.mxu0 %v3054_v55 }
  0x2f   :  { %v2548_v17 = vld [vmem:[#allocation2 + $0x284] ss:$16 sps:$4 sm:$0xff]   ;;  %v2551_v19 = vld [vmem:[#allocation2 + $0x280] ss:$16 sps:$4 sm:$0xff]  }
  0x30   :  { %1252 = vmatpush1.bf16.msra.mxu1 %v2538_v10  ;;  %v2552_v20 = vld [vmem:[#allocation2 + $0xa4] ss:$16 sps:$4 sm:$0xff]   ;;  %v2556_v22 = vld [vmem:[#allocation2 + $0xa0] ss:$16 sps:$4 sm:$0xff]  }
  0x31   :  { %1295 = vmatpush1.bf16.msra.mxu0 %v2539_v11  ;;  %1253 = vmatprep.subr.bf16.mxu1 %v2540_v12  ;;  %v2554_v21 = vld [vmem:[#allocation2 + $0x2a4] ss:$16 sps:$4 sm:$0xff]   ;;  %v2557_v23 = vld [vmem:[#allocation2 + $0x2a0] ss:$16 sps:$4 sm:$0xff]   ;;  %v2623_v11 = vld [vmem:[#allocation2 + $0xc] ss:$16 sps:$4 sm:$0xff]  }
  0x32   :  { %1296 = vmatprep.subr.bf16.mxu0 %v2542_v13  ;;  %v2558_v24 = vld [vmem:[#allocation2 + $0xc4] ss:$16 sps:$4 sm:$0xff]   ;;  %v2562_v26 = vld [vmem:[#allocation2 + $0xc0] ss:$16 sps:$4 sm:$0xff]  }
  0x33   :  { %v2560_v25 = vld [vmem:[#allocation2 + $0x2c4] ss:$16 sps:$4 sm:$0xff]   ;;  %v2563_v27 = vld [vmem:[#allocation2 + $0x2c0] ss:$16 sps:$4 sm:$0xff]  }
  0x34   :  { %1254 = vmatpush1.bf16.msra.mxu1 %v2544_v14  ;;  %v2564_v28 = vld [vmem:[#allocation2 + $0xe4] ss:$16 sps:$4 sm:$0xff]   ;;  %v2568_v30 = vld [vmem:[#allocation2 + $0xe0] ss:$16 sps:$4 sm:$0xff]   ;;  %v2621_v14 = vld [vmem:[#allocation2 + $0x8] ss:$16 sps:$4 sm:$0xff]  }
  0x35   :  { %1297 = vmatpush1.bf16.msra.mxu0 %v2545_v15  ;;  %1255 = vmatprep.subr.bf16.mxu1 %v2546_v16  ;;  %v2566_v29 = vld [vmem:[#allocation2 + $0x2e4] ss:$16 sps:$4 sm:$0xff]   ;;  %v2569_v31 = vld [vmem:[#allocation2 + $0x2e0] ss:$16 sps:$4 sm:$0xff]  }
  0x36   :  { %1298 = vmatprep.subr.bf16.mxu0 %v2548_v17  ;;  %v2570_v32 = vld [vmem:[#allocation2 + $0x104] ss:$16 sps:$4 sm:$0xff]   ;;  %v2574_v34 = vld [vmem:[#allocation2 + $0x100] ss:$16 sps:$4 sm:$0xff]   ;;  %v2629_v17 = vld [vmem:[#allocation2 + $0x2c] ss:$16 sps:$4 sm:$0xff]  }
  0x37   :  { %v2572_v33 = vld [vmem:[#allocation2 + $0x304] ss:$16 sps:$4 sm:$0xff]   ;;  %v2575_v35 = vld [vmem:[#allocation2 + $0x300] ss:$16 sps:$4 sm:$0xff]  }
  0x38   :  { %1256 = vmatpush1.bf16.msra.mxu1 %v2550_v18  ;;  %v2576_v36 = vld [vmem:[#allocation2 + $0x124] ss:$16 sps:$4 sm:$0xff]   ;;  %v2580_v38 = vld [vmem:[#allocation2 + $0x120] ss:$16 sps:$4 sm:$0xff]  }
  0x39   :  { %1299 = vmatpush1.bf16.msra.mxu0 %v2551_v19  ;;  %1257 = vmatprep.subr.bf16.mxu1 %v2552_v20  ;;  %v2578_v37 = vld [vmem:[#allocation2 + $0x324] ss:$16 sps:$4 sm:$0xff]   ;;  %v2581_v39 = vld [vmem:[#allocation2 + $0x320] ss:$16 sps:$4 sm:$0xff]   ;;  %v2627_v19 = vld [vmem:[#allocation2 + $0x28] ss:$16 sps:$4 sm:$0xff]  }
  0x3a   :  { %1300 = vmatprep.subr.bf16.mxu0 %v2554_v21  ;;  %v2582_v40 = vld [vmem:[#allocation2 + $0x144] ss:$16 sps:$4 sm:$0xff]   ;;  %v2586_v42 = vld [vmem:[#allocation2 + $0x140] ss:$16 sps:$4 sm:$0xff]   ;;  %v2635_v21 = vld [vmem:[#allocation2 + $0x4c] ss:$16 sps:$4 sm:$0xff]  }
  0x3b   :  { %v2584_v41 = vld [vmem:[#allocation2 + $0x344] ss:$16 sps:$4 sm:$0xff]   ;;  %v2587_v43 = vld [vmem:[#allocation2 + $0x340] ss:$16 sps:$4 sm:$0xff]  }
  0x3c   :  { %1258 = vmatpush1.bf16.msra.mxu1 %v2556_v22  ;;  %v2588_v44 = vld [vmem:[#allocation2 + $0x164] ss:$16 sps:$4 sm:$0xff]   ;;  %v2592_v47 = vld [vmem:[#allocation2 + $0x160] ss:$16 sps:$4 sm:$0xff]  }
  0x3d   :  { %1301 = vmatpush1.bf16.msra.mxu0 %v2557_v23  ;;  %1259 = vmatprep.subr.bf16.mxu1 %v2558_v24  ;;  %v2590_v45 = vld [vmem:[#allocation2 + $0x364] ss:$16 sps:$4 sm:$0xff]   ;;  %v2593_v48 = vld [vmem:[#allocation2 + $0x360] ss:$16 sps:$4 sm:$0xff]   ;;  %v2633_v23 = vld [vmem:[#allocation2 + $0x48] ss:$16 sps:$4 sm:$0xff]  }
  0x3e   :  { %1302 = vmatprep.subr.bf16.mxu0 %v2560_v25  ;;  %v2594_v53 = vld [vmem:[#allocation2 + $0x184] ss:$16 sps:$4 sm:$0xff]   ;;  %v2598_v56 = vld [vmem:[#allocation2 + $0x180] ss:$16 sps:$4 sm:$0xff]   ;;  %v2641_v25 = vld [vmem:[#allocation2 + $0x6c] ss:$16 sps:$4 sm:$0xff]  }
  0x3f   :  { %v2596_v54 = vld [vmem:[#allocation2 + $0x384] ss:$16 sps:$4 sm:$0xff]   ;;  %v2599_v57 = vld [vmem:[#allocation2 + $0x380] ss:$16 sps:$4 sm:$0xff]  }
  0x40   :  { %1260 = vmatpush1.bf16.msra.mxu1 %v2562_v26  ;;  %v2600_v58 = vld [vmem:[#allocation2 + $0x1a4] ss:$16 sps:$4 sm:$0xff]   ;;  %v2604_v60 = vld [vmem:[#allocation2 + $0x1a0] ss:$16 sps:$4 sm:$0xff]  }
  0x41   :  { %1303 = vmatpush1.bf16.msra.mxu0 %v2563_v27  ;;  %1261 = vmatprep.subr.bf16.mxu1 %v2564_v28  ;;  %v2602_v59 = vld [vmem:[#allocation2 + $0x3a4] ss:$16 sps:$4 sm:$0xff]   ;;  %v2605_v61 = vld [vmem:[#allocation2 + $0x3a0] ss:$16 sps:$4 sm:$0xff]   ;;  %v2639_v27 = vld [vmem:[#allocation2 + $0x68] ss:$16 sps:$4 sm:$0xff]  }
  0x42   :  { %1304 = vmatprep.subr.bf16.mxu0 %v2566_v29  ;;  %v2606_v62 = vld [vmem:[#allocation2 + $0x1c4] ss:$16 sps:$4 sm:$0xff]   ;;  %v2610_v0 = vld [vmem:[#allocation2 + $0x1c0] ss:$16 sps:$4 sm:$0xff]   ;;  %v2647_v29 = vld [vmem:[#allocation2 + $0x8c] ss:$16 sps:$4 sm:$0xff]  }
  0x43   :  { %v2608_v63 = vld [vmem:[#allocation2 + $0x3c4] ss:$16 sps:$4 sm:$0xff]   ;;  %v2611_v1 = vld [vmem:[#allocation2 + $0x3c0] ss:$16 sps:$4 sm:$0xff]  }
  0x44   :  { %1262 = vmatpush1.bf16.msra.mxu1 %v2568_v30  ;;  %v2612_v2 = vld [vmem:[#allocation2 + $0x1e4] ss:$16 sps:$4 sm:$0xff]   ;;  %v2616_v4 = vld [vmem:[#allocation2 + $0x1e0] ss:$16 sps:$4 sm:$0xff]  }
  0x45   :  { %1305 = vmatpush1.bf16.msra.mxu0 %v2569_v31  ;;  %1263 = vmatprep.subr.bf16.mxu1 %v2570_v32  ;;  %v2614_v3 = vld [vmem:[#allocation2 + $0x3e4] ss:$16 sps:$4 sm:$0xff]   ;;  %v2617_v5 = vld [vmem:[#allocation2 + $0x3e0] ss:$16 sps:$4 sm:$0xff]   ;;  %v2645_v31 = vld [vmem:[#allocation2 + $0x88] ss:$16 sps:$4 sm:$0xff]  }
  0x46   :  { %1306 = vmatprep.subr.bf16.mxu0 %v2572_v33  ;;  %v55_v6 = vld [vmem:[%s3183_s0] sm:$0xff]  ;;  %v61_v7 = vld [vmem:[%s3183_s0 + $0x30] sm:$0xff]  ;;  %v2653_v33 = vld [vmem:[#allocation2 + $0xac] ss:$16 sps:$4 sm:$0xff]  }
  0x47   :  { %v2620_v8 = vld [vmem:[#allocation2 + $0x404] ss:$16 sps:$4 sm:$0xff]   ;;  %v3070_v12 = vpack.c.bf16 %v61_v7, %v55_v6  ;;  %v2618_v13 = vld [vmem:[#allocation2 + $0x400] ss:$16 sps:$4 sm:$0xff]   ;;  %v2699_v7 = vld [vmem:[#allocation2 + $0x1a8] ss:$16 sps:$4 sm:$0xff]  }
  0x48   :  { %1264 = vmatpush1.bf16.msra.mxu1 %v2574_v34  ;;  %v57_v9 = vld [vmem:[%s3183_s0 + $0x10] sm:$0xff]  ;;  %v63_v10 = vld [vmem:[%s3183_s0 + $0x40] sm:$0xff] }
  0x49   :  { %1307 = vmatpush1.bf16.msra.mxu0 %v2575_v35  ;;  %1265 = vmatprep.subr.bf16.mxu1 %v2576_v36  ;;  %v3072_v15 = vpack.c.bf16 %v63_v10, %v57_v9  ;;  %v2626_v16 = vld [vmem:[#allocation2 + $0x424] ss:$16 sps:$4 sm:$0xff]   ;;  %v2624_v18 = vld [vmem:[#allocation2 + $0x420] ss:$16 sps:$4 sm:$0xff]   ;;  %v2651_v35 = vld [vmem:[#allocation2 + $0xa8] ss:$16 sps:$4 sm:$0xff]  }
  0x4a   :  { %1308 = vmatprep.subr.bf16.mxu0 %v2578_v37  ;;  %v2632_v20 = vld [vmem:[#allocation2 + $0x444] ss:$16 sps:$4 sm:$0xff]   ;;  %v2630_v22 = vld [vmem:[#allocation2 + $0x440] ss:$16 sps:$4 sm:$0xff]   ;;  %v2659_v37 = vld [vmem:[#allocation2 + $0xcc] ss:$16 sps:$4 sm:$0xff]  }
  0x4b   :  { %v2638_v24 = vld [vmem:[#allocation2 + $0x464] ss:$16 sps:$4 sm:$0xff]   ;;  %v2636_v26 = vld [vmem:[#allocation2 + $0x460] ss:$16 sps:$4 sm:$0xff]   ;;  %v2707_v9 = vld [vmem:[#allocation2 + $0x1cc] ss:$16 sps:$4 sm:$0xff]  }
  0x4c   :  { %1266 = vmatpush1.bf16.msra.mxu1 %v2580_v38  ;;  %v2644_v28 = vld [vmem:[#allocation2 + $0x484] ss:$16 sps:$4 sm:$0xff]   ;;  %v2642_v30 = vld [vmem:[#allocation2 + $0x480] ss:$16 sps:$4 sm:$0xff]  }
  0x4d   :  { %1309 = vmatpush1.bf16.msra.mxu0 %v2581_v39  ;;  %1267 = vmatprep.subr.bf16.mxu1 %v2582_v40  ;;  %v2650_v32 = vld [vmem:[#allocation2 + $0x4a4] ss:$16 sps:$4 sm:$0xff]   ;;  %v2648_v34 = vld [vmem:[#allocation2 + $0x4a0] ss:$16 sps:$4 sm:$0xff]   ;;  %v2657_v39 = vld [vmem:[#allocation2 + $0xc8] ss:$16 sps:$4 sm:$0xff]  }
  0x4e   :  { %1310 = vmatprep.subr.bf16.mxu0 %v2584_v41  ;;  %v2656_v36 = vld [vmem:[#allocation2 + $0x4c4] ss:$16 sps:$4 sm:$0xff]   ;;  %v2654_v38 = vld [vmem:[#allocation2 + $0x4c0] ss:$16 sps:$4 sm:$0xff]   ;;  %v60_v41 = vld [vmem:[%s3183_s0 + $0x28] sm:$0xff] }
  0x4f   :  { %v2662_v40 = vld [vmem:[#allocation2 + $0x4e4] ss:$16 sps:$4 sm:$0xff]   ;;  %v2666_v49 = vld [vmem:[#allocation2 + $0x500] ss:$16 sps:$4 sm:$0xff]  }
  0x50   :  { %1268 = vmatpush1.bf16.msra.mxu1 %v2586_v42  ;;  %v66_v42 = vld [vmem:[%s3183_s0 + $0x58] sm:$0xff]  ;;  %v2674_v51 = vld [vmem:[#allocation2 + $0x524] ss:$16 sps:$4 sm:$0xff]   ;;  %v2696_v6 = vld [vmem:[#allocation2 + $0x5a0] ss:$16 sps:$4 sm:$0xff]  }
  0x51   :  { %1311 = vmatpush1.bf16.msra.mxu0 %v2587_v43  ;;  %1269 = vmatprep.subr.bf16.mxu1 %v2588_v44  ;;  %v2665_v43 = vld [vmem:[#allocation2 + $0xec] ss:$16 sps:$4 sm:$0xff]   ;;  %v3083_v44 = vpack.c.bf16 %v66_v42, %v60_v41  ;;  %v2702_v10 = vld [vmem:[#allocation2 + $0x5c0] ss:$16 sps:$4 sm:$0xff]   ;;  %v2738_v41 = vld [vmem:[#allocation2 + $0x308] ss:$16 sps:$4 sm:$0xff]  }
  0x52   :  { %1312 = vmatprep.subr.bf16.mxu0 %v2590_v45  ;;  %v2660_v45 = vld [vmem:[#allocation2 + $0x4e0] ss:$16 sps:$4 sm:$0xff]   ;;  %v2743_v42 = vld [vmem:[#allocation2 + $0x32c] ss:$16 sps:$4 sm:$0xff]  }
  0x54   :  { %1270 = vmatpush1.bf16.msra.mxu1 %v2592_v47  ;;  %v2668_v47 = vld [vmem:[#allocation2 + $0x504] ss:$16 sps:$4 sm:$0xff]  }
  0x55   :  { %1313 = vmatpush1.bf16.msra.mxu0 %v2593_v48  ;;  %1271 = vmatprep.subr.bf16.mxu1 %v2594_v53  ;;  %v2671_v48 = vld [vmem:[#allocation2 + $0x10c] ss:$16 sps:$4 sm:$0xff]   ;;  %v2672_v53 = vld [vmem:[#allocation2 + $0x520] ss:$16 sps:$4 sm:$0xff]  }
  0x56   :  { %1314 = vmatprep.subr.bf16.mxu0 %v2596_v54  ;;  %v2675_v54 = vld [vmem:[#allocation2 + $0x128] ss:$16 sps:$4 sm:$0xff]  }
  0x58   :  { %1272 = vmatpush1.bf16.msra.mxu1 %v2598_v56  ;;  %v2680_v56 = vld [vmem:[#allocation2 + $0x544] ss:$16 sps:$4 sm:$0xff]  }
  0x59   :  { %1315 = vmatpush1.bf16.msra.mxu0 %v2599_v57  ;;  %1273 = vmatprep.subr.bf16.mxu1 %v2600_v58  ;;  %v2683_v57 = vld [vmem:[#allocation2 + $0x14c] ss:$16 sps:$4 sm:$0xff]   ;;  %v2678_v58 = vld [vmem:[#allocation2 + $0x540] ss:$16 sps:$4 sm:$0xff]  }
  0x5a   :  { %1316 = vmatprep.subr.bf16.mxu0 %v2602_v59  ;;  %v2681_v59 = vld [vmem:[#allocation2 + $0x148] ss:$16 sps:$4 sm:$0xff]  }
  0x5c   :  { %1274 = vmatpush1.bf16.msra.mxu1 %v2604_v60  ;;  %v2686_v60 = vld [vmem:[#allocation2 + $0x564] ss:$16 sps:$4 sm:$0xff]  }
  0x5d   :  { %1317 = vmatpush1.bf16.msra.mxu0 %v2605_v61  ;;  %1275 = vmatprep.subr.bf16.mxu1 %v2606_v62  ;;  %v2689_v61 = vld [vmem:[#allocation2 + $0x16c] ss:$16 sps:$4 sm:$0xff]   ;;  %v2684_v62 = vld [vmem:[#allocation2 + $0x560] ss:$16 sps:$4 sm:$0xff]  }
  0x5e   :  { %1318 = vmatprep.subr.bf16.mxu0 %v2608_v63  ;;  %v2687_v63 = vld [vmem:[#allocation2 + $0x168] ss:$16 sps:$4 sm:$0xff]  }
  0x60   :  { %1276 = vmatpush1.bf16.msra.mxu1 %v2610_v0  ;;  %v2692_v0 = vld [vmem:[#allocation2 + $0x584] ss:$16 sps:$4 sm:$0xff]  }
  0x61   :  { %1319 = vmatpush1.bf16.msra.mxu0 %v2611_v1  ;;  %1277 = vmatprep.subr.bf16.mxu1 %v2612_v2  ;;  %v2695_v1 = vld [vmem:[#allocation2 + $0x18c] ss:$16 sps:$4 sm:$0xff]   ;;  %v2690_v2 = vld [vmem:[#allocation2 + $0x580] ss:$16 sps:$4 sm:$0xff]  }
  0x62   :  { %1320 = vmatprep.subr.bf16.mxu0 %v2614_v3  ;;  %v2693_v3 = vld [vmem:[#allocation2 + $0x188] ss:$16 sps:$4 sm:$0xff]  }
  0x64   :  { %1278 = vmatpush1.bf16.msra.mxu1 %v2616_v4  ;;  %v2698_v4 = vld [vmem:[#allocation2 + $0x5a4] ss:$16 sps:$4 sm:$0xff]  }
  0x65   :  { %1321 = vmatpush1.bf16.msra.mxu0 %v2617_v5  ;;  %1376 = vmatprep.subr.bf16.mxu1 %v2623_v11  ;;  %v2701_v5 = vld [vmem:[#allocation2 + $0x1ac] ss:$16 sps:$4 sm:$0xff]   ;;  %v2705_v11 = vld [vmem:[#allocation2 + $0x1c8] ss:$16 sps:$4 sm:$0xff]  }
  0x66   :  { %1333 = vmatprep.subr.bf16.mxu0 %v2620_v8  ;;  %v2704_v8 = vld [vmem:[#allocation2 + $0x5c4] ss:$16 sps:$4 sm:$0xff]  }
  0x67   :  { %1280 = vmatmul.mubr.bf16.vlgmr.msra.gmra.mrb[0].mxu1 %v3070_v12 }
  0x68   :  { %1323 = vmatmul.mubr.bf16.vlgmr.msra.gmra.mrb[0].mxu0 %v3072_v15  ;;  %1377 = vmatpush1.bf16.msra.mxu1 %v2621_v14  ;;  %v2713_v14 = vld [vmem:[#allocation2 + $0x1ec] ss:$16 sps:$4 sm:$0xff]  }
  0x69   :  { %1334 = vmatpush1.bf16.msra.mxu0 %v2618_v13  ;;  %1378 = vmatprep.subr.bf16.mxu1 %v2629_v17  ;;  %v2710_v13 = vld [vmem:[#allocation2 + $0x5e4] ss:$16 sps:$4 sm:$0xff]   ;;  %v2711_v17 = vld [vmem:[#allocation2 + $0x1e8] ss:$16 sps:$4 sm:$0xff]  }
  0x6a   :  { %1335 = vmatprep.subr.bf16.mxu0 %v2626_v16  ;;  %1408 = vmatprep.mubr.bf16.mxu1 %v3046_v50  ;;  %v2669_v50 = vld [vmem:[#allocation2 + $0x108] ss:$16 sps:$4 sm:$0xff]   ;;  %v2708_v16 = vld [vmem:[#allocation2 + $0x5e0] ss:$16 sps:$4 sm:$0xff]  }
  0x6b   :  { %1365 = vmatprep.mubr.bf16.mxu0 %v3083_v44 }
  0x6c   :  { %1379 = vmatpush1.bf16.msra.mxu1 %v2627_v19  ;;  %v65_v19 = vld [vmem:[%s3183_s0 + $0x50] sm:$0xff] }
  0x6d   :  { %1336 = vmatpush1.bf16.msra.mxu0 %v2624_v18  ;;  %1380 = vmatprep.subr.bf16.mxu1 %v2635_v21  ;;  %v59_v18 = vld [vmem:[%s3183_s0 + $0x20] sm:$0xff] }
  0x6e   :  { %1337 = vmatprep.subr.bf16.mxu0 %v2632_v20  ;;  %v2716_v20 = vld [vmem:[#allocation2 + $0x20c] ss:$16 sps:$4 sm:$0xff]   ;;  %v3092_v21 = vpack.c.bf16 %v65_v19, %v59_v18  ;;  %v2843_v19 = vld [vmem:[#allocation4 + $0xb0] ss:$8 sps:$4 sm:$0xff]  }
  0x6f   :  { %v2770_v18 = vld [vmem:[#allocation2 + $0x44c] ss:$16 sps:$4 sm:$0xff]  }
  0x70   :  { %1381 = vmatpush1.bf16.msra.mxu1 %v2633_v23  ;;  %v2719_v23 = vld [vmem:[#allocation2 + $0x22c] ss:$16 sps:$4 sm:$0xff]  }
  0x71   :  { %1338 = vmatpush1.bf16.msra.mxu0 %v2630_v22  ;;  %1382 = vmatprep.subr.bf16.mxu1 %v2641_v25  ;;  %v2714_v22 = vld [vmem:[#allocation2 + $0x208] ss:$16 sps:$4 sm:$0xff]   ;;  %v2722_v25 = vld [vmem:[#allocation2 + $0x24c] ss:$16 sps:$4 sm:$0xff]  }
  0x72   :  { %1339 = vmatprep.subr.bf16.mxu0 %v2638_v24  ;;  %v2717_v24 = vld [vmem:[#allocation2 + $0x228] ss:$16 sps:$4 sm:$0xff]  }
  0x74   :  { %1383 = vmatpush1.bf16.msra.mxu1 %v2639_v27  ;;  %v2725_v27 = vld [vmem:[#allocation2 + $0x26c] ss:$16 sps:$4 sm:$0xff]  }
  0x75   :  { %1340 = vmatpush1.bf16.msra.mxu0 %v2636_v26  ;;  %1384 = vmatprep.subr.bf16.mxu1 %v2647_v29  ;;  %v2720_v26 = vld [vmem:[#allocation2 + $0x248] ss:$16 sps:$4 sm:$0xff]   ;;  %v2728_v29 = vld [vmem:[#allocation2 + $0x28c] ss:$16 sps:$4 sm:$0xff]  }
  0x76   :  { %1341 = vmatprep.subr.bf16.mxu0 %v2644_v28  ;;  %v2723_v28 = vld [vmem:[#allocation2 + $0x268] ss:$16 sps:$4 sm:$0xff]  }
  0x78   :  { %1385 = vmatpush1.bf16.msra.mxu1 %v2645_v31  ;;  %v2731_v31 = vld [vmem:[#allocation2 + $0x2ac] ss:$16 sps:$4 sm:$0xff]  }
  0x79   :  { %1342 = vmatpush1.bf16.msra.mxu0 %v2642_v30  ;;  %1386 = vmatprep.subr.bf16.mxu1 %v2653_v33  ;;  %v2726_v30 = vld [vmem:[#allocation2 + $0x288] ss:$16 sps:$4 sm:$0xff]  }
  0x7a   :  { %1343 = vmatprep.subr.bf16.mxu0 %v2650_v32  ;;  %v2729_v32 = vld [vmem:[#allocation2 + $0x2a8] ss:$16 sps:$4 sm:$0xff]  }
  0x7b   :  { %v2732_v33 = vld [vmem:[#allocation2 + $0x2c8] ss:$16 sps:$4 sm:$0xff]  }
  0x7c   :  { %1387 = vmatpush1.bf16.msra.mxu1 %v2651_v35  ;;  %v2812_v35 = vld [vmem:[#allocation4 + $0x4] ss:$8 sps:$4 sm:$0xff]  }
  0x7d   :  { %1344 = vmatpush1.bf16.msra.mxu0 %v2648_v34  ;;  %1388 = vmatprep.subr.bf16.mxu1 %v2659_v37  ;;  %v2737_v34 = vld [vmem:[#allocation2 + $0x2ec] ss:$16 sps:$4 sm:$0xff]   ;;  %v2735_v37 = vld [vmem:[#allocation2 + $0x2e8] ss:$16 sps:$4 sm:$0xff]  }
  0x7e   :  { %1345 = vmatprep.subr.bf16.mxu0 %v2656_v36  ;;  %v2815_v36 = vld [vmem:[#allocation4 + $0x14] ss:$8 sps:$4 sm:$0xff]  }
  0x80   :  { %1389 = vmatpush1.bf16.msra.mxu1 %v2657_v39  ;;  %v2813_v39 = vld [vmem:[#allocation4 + $0x10] ss:$8 sps:$4 sm:$0xff]  }
  0x81   :  { %1346 = vmatpush1.bf16.msra.mxu0 %v2654_v38  ;;  %1390 = vmatprep.subr.bf16.mxu1 %v2665_v43  ;;  %v2740_v38 = vld [vmem:[#allocation2 + $0x30c] ss:$16 sps:$4 sm:$0xff]   ;;  %v2816_v43 = vld [vmem:[#allocation4 + $0x20] ss:$8 sps:$4 sm:$0xff]  }
  0x82   :  { %1347 = vmatprep.subr.bf16.mxu0 %v2662_v40  ;;  %v2818_v40 = vld [vmem:[#allocation4 + $0x24] ss:$8 sps:$4 sm:$0xff]  }
  0x84   :  { %1391 = vmatpush1.bf16.msra.mxu1 %v2663_v46  ;;  %v2821_v46 = vld [vmem:[#allocation4 + $0x34] ss:$8 sps:$4 sm:$0xff]  }
  0x85   :  { %1348 = vmatpush1.bf16.msra.mxu0 %v2660_v45  ;;  %1392 = vmatprep.subr.bf16.mxu1 %v2671_v48  ;;  %v2741_v45 = vld [vmem:[#allocation2 + $0x328] ss:$16 sps:$4 sm:$0xff]  }
  0x86   :  { %1349 = vmatprep.subr.bf16.mxu0 %v2668_v47  ;;  %v2746_v47 = vld [vmem:[#allocation2 + $0x34c] ss:$16 sps:$4 sm:$0xff]   ;;  %v2819_v48 = vld [vmem:[#allocation4 + $0x30] ss:$8 sps:$4 sm:$0xff]  }
  0x88   :  { %1393 = vmatpush1.bf16.msra.mxu1 %v2669_v50  ;;  %v2744_v50 = vld [vmem:[#allocation2 + $0x348] ss:$16 sps:$4 sm:$0xff]  }
  0x89   :  { %1350 = vmatpush1.bf16.msra.mxu0 %v2666_v49  ;;  %1394 = vmatprep.subr.bf16.mxu1 %v2677_v52  ;;  %v2824_v49 = vld [vmem:[#allocation4 + $0x44] ss:$8 sps:$4 sm:$0xff]   ;;  %v2822_v52 = vld [vmem:[#allocation4 + $0x40] ss:$8 sps:$4 sm:$0xff]  }
  0x8a   :  { %1351 = vmatprep.subr.bf16.mxu0 %v2674_v51  ;;  %v2749_v51 = vld [vmem:[#allocation2 + $0x36c] ss:$16 sps:$4 sm:$0xff]  }
  0x8c   :  { %1395 = vmatpush1.bf16.msra.mxu1 %v2675_v54  ;;  %v2747_v54 = vld [vmem:[#allocation2 + $0x368] ss:$16 sps:$4 sm:$0xff]  }
  0x8d   :  { %1352 = vmatpush1.bf16.msra.mxu0 %v2672_v53  ;;  %1396 = vmatprep.subr.bf16.mxu1 %v2683_v57  ;;  %v2827_v53 = vld [vmem:[#allocation4 + $0x54] ss:$8 sps:$4 sm:$0xff]   ;;  %v2825_v57 = vld [vmem:[#allocation4 + $0x50] ss:$8 sps:$4 sm:$0xff]  }
  0x8e   :  { %1353 = vmatprep.subr.bf16.mxu0 %v2680_v56  ;;  %v2752_v56 = vld [vmem:[#allocation2 + $0x38c] ss:$16 sps:$4 sm:$0xff]  }
  0x90   :  { %1397 = vmatpush1.bf16.msra.mxu1 %v2681_v59  ;;  %v2750_v59 = vld [vmem:[#allocation2 + $0x388] ss:$16 sps:$4 sm:$0xff]  }
  0x91   :  { %1354 = vmatpush1.bf16.msra.mxu0 %v2678_v58  ;;  %1398 = vmatprep.subr.bf16.mxu1 %v2689_v61  ;;  %v2830_v58 = vld [vmem:[#allocation4 + $0x64] ss:$8 sps:$4 sm:$0xff]   ;;  %v2828_v61 = vld [vmem:[#allocation4 + $0x60] ss:$8 sps:$4 sm:$0xff]  }
  0x92   :  { %1355 = vmatprep.subr.bf16.mxu0 %v2686_v60  ;;  %v2755_v60 = vld [vmem:[#allocation2 + $0x3ac] ss:$16 sps:$4 sm:$0xff]  }
  0x94   :  { %1399 = vmatpush1.bf16.msra.mxu1 %v2687_v63  ;;  %v2753_v63 = vld [vmem:[#allocation2 + $0x3a8] ss:$16 sps:$4 sm:$0xff]  }
  0x95   :  { %1356 = vmatpush1.bf16.msra.mxu0 %v2684_v62  ;;  %1400 = vmatprep.subr.bf16.mxu1 %v2695_v1  ;;  %v2833_v62 = vld [vmem:[#allocation4 + $0x74] ss:$8 sps:$4 sm:$0xff]   ;;  %v2831_v1 = vld [vmem:[#allocation4 + $0x70] ss:$8 sps:$4 sm:$0xff]  }
  0x96   :  { %1357 = vmatprep.subr.bf16.mxu0 %v2692_v0  ;;  %v2758_v0 = vld [vmem:[#allocation2 + $0x3cc] ss:$16 sps:$4 sm:$0xff]  }
  0x98   :  { %1401 = vmatpush1.bf16.msra.mxu1 %v2693_v3  ;;  %v2756_v3 = vld [vmem:[#allocation2 + $0x3c8] ss:$16 sps:$4 sm:$0xff]  }
  0x99   :  { %1358 = vmatpush1.bf16.msra.mxu0 %v2690_v2  ;;  %1402 = vmatprep.subr.bf16.mxu1 %v2701_v5  ;;  %v2836_v2 = vld [vmem:[#allocation4 + $0x84] ss:$8 sps:$4 sm:$0xff]   ;;  %v2834_v5 = vld [vmem:[#allocation4 + $0x80] ss:$8 sps:$4 sm:$0xff]  }
  0x9a   :  { %1359 = vmatprep.subr.bf16.mxu0 %v2698_v4  ;;  %v2761_v4 = vld [vmem:[#allocation2 + $0x3ec] ss:$16 sps:$4 sm:$0xff]  }
  0x9c   :  { %1403 = vmatpush1.bf16.msra.mxu1 %v2699_v7  ;;  %v2759_v7 = vld [vmem:[#allocation2 + $0x3e8] ss:$16 sps:$4 sm:$0xff]  }
  0x9d   :  { %1360 = vmatpush1.bf16.msra.mxu0 %v2696_v6  ;;  %1404 = vmatprep.subr.bf16.mxu1 %v2707_v9  ;;  %v2839_v6 = vld [vmem:[#allocation4 + $0x94] ss:$8 sps:$4 sm:$0xff]   ;;  %v2837_v9 = vld [vmem:[#allocation4 + $0x90] ss:$8 sps:$4 sm:$0xff]  }
  0x9e   :  { %1361 = vmatprep.subr.bf16.mxu0 %v2704_v8  ;;  %v2764_v8 = vld [vmem:[#allocation2 + $0x40c] ss:$16 sps:$4 sm:$0xff]  }
  0xa0   :  { %1405 = vmatpush1.bf16.msra.mxu1 %v2705_v11  ;;  %v2762_v11 = vld [vmem:[#allocation2 + $0x408] ss:$16 sps:$4 sm:$0xff]  }
  0xa1   :  { %1362 = vmatpush1.bf16.msra.mxu0 %v2702_v10  ;;  %1406 = vmatprep.subr.bf16.mxu1 %v2713_v14  ;;  %v2842_v10 = vld [vmem:[#allocation4 + $0xa4] ss:$8 sps:$4 sm:$0xff]   ;;  %v2840_v14 = vld [vmem:[#allocation4 + $0xa0] ss:$8 sps:$4 sm:$0xff]  }
  0xa2   :  { %1363 = vmatprep.subr.bf16.mxu0 %v2710_v13  ;;  %v2767_v13 = vld [vmem:[#allocation2 + $0x42c] ss:$16 sps:$4 sm:$0xff]  }
  0xa4   :  { %1407 = vmatpush1.bf16.msra.mxu1 %v2711_v17  ;;  %v2765_v17 = vld [vmem:[#allocation2 + $0x428] ss:$16 sps:$4 sm:$0xff]  }
  0xa5   :  { %1364 = vmatpush1.bf16.msra.mxu0 %v2708_v16  ;;  %1419 = vmatprep.subr.bf16.mxu1 %v2716_v20  ;;  %v2845_v16 = vld [vmem:[#allocation4 + $0xb4] ss:$8 sps:$4 sm:$0xff]   ;;  %v2848_v20 = vld [vmem:[#allocation4 + $0xc4] ss:$8 sps:$4 sm:$0xff]  }
  0xa6   :  { %1913 = vmatprep.subr.bf16.mxu0 %v2812_v35  ;;  %v2855_v35 = vld [vmem:[#allocation4 + $0xf0] ss:$8 sps:$4 sm:$0xff]  }
  0xa7   :  { %1409 = vmatmul.mubr.bf16.vlgmr.msra.gmra.mrb[4].mxu1 %v3070_v12  ;;  %v2734_v12 = vld [vmem:[#allocation2 + $0x2cc] ss:$16 sps:$4 sm:$0xff]  }
  0xa8   :  { %1366 = vmatmul.mubr.bf16.vlgmr.msra.gmra.mrb[0].mxu0 %v3092_v21  ;;  %1420 = vmatpush1.bf16.msra.mxu1 %v2714_v22  ;;  %v2768_v22 = vld [vmem:[#allocation2 + $0x448] ss:$16 sps:$4 sm:$0xff]  }
  0xa9   :  { %1451 = vmatprep.mubr.bf16.mxu1 %v3054_v55  ;;  %1421 = vmatprep.subr.bf16.mxu1 %v2719_v23  ;;  %v2810_v55 = vld [vmem:[#allocation4] ss:$8 sps:$4 sm:$0xff]   ;;  %v2773_v23 = vld [vmem:[#allocation2 + $0x46c] ss:$16 sps:$4 sm:$0xff]  }
  0xaa   :  { %1914 = vmatpush1.bf16.msra.mxu0 %v2810_v55  ;;  %v2783_v55 = vld [vmem:[#allocation2 + $0x4e8] ss:$16 sps:$4 sm:$0xff]  }
  0xab   :  { %1915 = vmatprep.subr.bf16.mxu0 %v2815_v36  ;;  %v2788_v36 = vld [vmem:[#allocation2 + $0x50c] ss:$16 sps:$4 sm:$0xff]  }
  0xac   :  { %1422 = vmatpush1.bf16.msra.mxu1 %v2717_v24  ;;  %v2846_v24 = vld [vmem:[#allocation4 + $0xc0] ss:$8 sps:$4 sm:$0xff]  }
  0xad   :  { %1423 = vmatprep.subr.bf16.mxu1 %v2722_v25  ;;  %v2851_v25 = vld [vmem:[#allocation4 + $0xd4] ss:$8 sps:$4 sm:$0xff]  }
  0xae   :  { %1916 = vmatpush1.bf16.msra.mxu0 %v2813_v39  ;;  %v2860_v39 = vld [vmem:[#allocation4 + $0x104] ss:$8 sps:$4 sm:$0xff]  }
  0xaf   :  { %1917 = vmatprep.subr.bf16.mxu0 %v2818_v40  ;;  %v2789_v40 = vld [vmem:[#allocation2 + $0x528] ss:$16 sps:$4 sm:$0xff]  }
  0xb0   :  { %1424 = vmatpush1.bf16.msra.mxu1 %v2720_v26  ;;  %v2776_v26 = vld [vmem:[#allocation2 + $0x48c] ss:$16 sps:$4 sm:$0xff]  }
  0xb1   :  { %1425 = vmatprep.subr.bf16.mxu1 %v2725_v27  ;;  %v2774_v27 = vld [vmem:[#allocation2 + $0x488] ss:$16 sps:$4 sm:$0xff]  }
  0xb2   :  { %1918 = vmatpush1.bf16.msra.mxu0 %v2816_v43  ;;  %v2797_v43 = vld [vmem:[#allocation2 + $0x56c] ss:$16 sps:$4 sm:$0xff]  }
  0xb3   :  { %1919 = vmatprep.subr.bf16.mxu0 %v2821_v46  ;;  %v2800_v46 = vld [vmem:[#allocation2 + $0x58c] ss:$16 sps:$4 sm:$0xff]  }
  0xb4   :  { %1426 = vmatpush1.bf16.msra.mxu1 %v2723_v28  ;;  %v2779_v28 = vld [vmem:[#allocation2 + $0x4ac] ss:$16 sps:$4 sm:$0xff]  }
  0xb5   :  { %1427 = vmatprep.subr.bf16.mxu1 %v2728_v29  ;;  %v2777_v29 = vld [vmem:[#allocation2 + $0x4a8] ss:$16 sps:$4 sm:$0xff]  }
  0xb6   :  { %1920 = vmatpush1.bf16.msra.mxu0 %v2819_v48  ;;  %v2803_v48 = vld [vmem:[#allocation2 + $0x5ac] ss:$16 sps:$4 sm:$0xff]  }
  0xb7   :  { %1921 = vmatprep.subr.bf16.mxu0 %v2824_v49  ;;  %v2801_v49 = vld [vmem:[#allocation2 + $0x5a8] ss:$16 sps:$4 sm:$0xff]  }
  0xb8   :  { %1428 = vmatpush1.bf16.msra.mxu1 %v2726_v30  ;;  %v2782_v30 = vld [vmem:[#allocation2 + $0x4cc] ss:$16 sps:$4 sm:$0xff]  }
  0xb9   :  { %1429 = vmatprep.subr.bf16.mxu1 %v2731_v31  ;;  %v2854_v31 = vld [vmem:[#allocation4 + $0xe4] ss:$8 sps:$4 sm:$0xff]  }
  0xba   :  { %1922 = vmatpush1.bf16.msra.mxu0 %v2822_v52  ;;  %v2809_v52 = vld [vmem:[#allocation2 + $0x5ec] ss:$16 sps:$4 sm:$0xff]  }
  0xbb   :  { %1923 = vmatprep.subr.bf16.mxu0 %v2827_v53  ;;  %v2807_v53 = vld [vmem:[#allocation2 + $0x5e8] ss:$16 sps:$4 sm:$0xff]  }
  0xbc   :  { %1430 = vmatpush1.bf16.msra.mxu1 %v2729_v32  ;;  %v2780_v32 = vld [vmem:[#allocation2 + $0x4c8] ss:$16 sps:$4 sm:$0xff]  }
  0xbd   :  { %1431 = vmatprep.subr.bf16.mxu1 %v2734_v12  ;;  %v2852_v12 = vld [vmem:[#allocation4 + $0xe0] ss:$8 sps:$4 sm:$0xff]  }
  0xbe   :  { %1924 = vmatpush1.bf16.msra.mxu0 %v2825_v57 }
  0xbf   :  { %1925 = vmatprep.subr.bf16.mxu0 %v2830_v58 }
  0xc0   :  { %1432 = vmatpush1.bf16.msra.mxu1 %v2732_v33  ;;  %v2785_v33 = vld [vmem:[#allocation2 + $0x4ec] ss:$16 sps:$4 sm:$0xff]  }
  0xc1   :  { %1433 = vmatprep.subr.bf16.mxu1 %v2737_v34  ;;  %v2857_v34 = vld [vmem:[#allocation4 + $0xf4] ss:$8 sps:$4 sm:$0xff]  }
  0xc2   :  { %1926 = vmatpush1.bf16.msra.mxu0 %v2828_v61 }
  0xc3   :  { %1927 = vmatprep.subr.bf16.mxu0 %v2833_v62  ;;  %v3106_v62 = vld [vmem:[%s3185_s2] sm:$0xf] }
  0xc4   :  { %1434 = vmatpush1.bf16.msra.mxu1 %v2735_v37  ;;  %v2786_v37 = vld [vmem:[#allocation2 + $0x508] ss:$16 sps:$4 sm:$0xff]  }
  0xc5   :  { %1435 = vmatprep.subr.bf16.mxu1 %v2740_v38  ;;  %v2791_v38 = vld [vmem:[#allocation2 + $0x52c] ss:$16 sps:$4 sm:$0xff]  }
  0xc6   :  { %1928 = vmatpush1.bf16.msra.mxu0 %v2831_v1 }
  0xc7   :  { %1929 = vmatprep.subr.bf16.mxu0 %v2836_v2 }
  0xc8   :  { %1436 = vmatpush1.bf16.msra.mxu1 %v2738_v41  ;;  %v2794_v41 = vld [vmem:[#allocation2 + $0x54c] ss:$16 sps:$4 sm:$0xff]  }
  0xc9   :  { %1437 = vmatprep.subr.bf16.mxu1 %v2743_v42  ;;  %v2792_v42 = vld [vmem:[#allocation2 + $0x548] ss:$16 sps:$4 sm:$0xff]  }
  0xca   :  { %1930 = vmatpush1.bf16.msra.mxu0 %v2834_v5 }
  0xcb   :  { %1931 = vmatprep.subr.bf16.mxu0 %v2839_v6 }
  0xcc   :  { %1438 = vmatpush1.bf16.msra.mxu1 %v2741_v45  ;;  %v2795_v45 = vld [vmem:[#allocation2 + $0x568] ss:$16 sps:$4 sm:$0xff]  }
  0xcd   :  { %1439 = vmatprep.subr.bf16.mxu1 %v2746_v47  ;;  %v2798_v47 = vld [vmem:[#allocation2 + $0x588] ss:$16 sps:$4 sm:$0xff]  }
  0xce   :  { %1932 = vmatpush1.bf16.msra.mxu0 %v2837_v9 }
  0xcf   :  { %1933 = vmatprep.subr.bf16.mxu0 %v2842_v10 }
  0xd0   :  { %1440 = vmatpush1.bf16.msra.mxu1 %v2744_v50  ;;  %v2806_v50 = vld [vmem:[#allocation2 + $0x5cc] ss:$16 sps:$4 sm:$0xff]  }
  0xd1   :  { %1441 = vmatprep.subr.bf16.mxu1 %v2749_v51  ;;  %v2804_v51 = vld [vmem:[#allocation2 + $0x5c8] ss:$16 sps:$4 sm:$0xff]  }
  0xd2   :  { %1934 = vmatpush1.bf16.msra.mxu0 %v2840_v14 }
  0xd3   :  { %1935 = vmatprep.subr.bf16.mxu0 %v2845_v16 }
  0xd4   :  { %1442 = vmatpush1.bf16.msra.mxu1 %v2747_v54 }
  0xd5   :  { %1443 = vmatprep.subr.bf16.mxu1 %v2752_v56 }
  0xd6   :  { %1936 = vmatpush1.bf16.msra.mxu0 %v2843_v19 }
  0xd7   :  { %1937 = vmatprep.subr.bf16.mxu0 %v2848_v20 }
  0xd8   :  { %1444 = vmatpush1.bf16.msra.mxu1 %v2750_v59  ;;  %v267_v59 = vlaneseq }
  0xd9   :  { %1445 = vmatprep.subr.bf16.mxu1 %v2755_v60 }
  0xda   :  { %1938 = vmatpush1.bf16.msra.mxu0 %v2846_v24  ;;  %v3100_v60 = vshrl.u32 %v267_v59, 7  ;;  %v2906_v24 = vld [vmem:[%s3188_s5 + $0x40] sm:$0xff]  }
  0xdb   :  { %1939 = vmatprep.subr.bf16.mxu0 %v2851_v25  ;;  %v2907_v25 = vld [vmem:[%s3188_s5] sm:$0xff]  }
  0xdc   :  { %1446 = vmatpush1.bf16.msra.mxu1 %v2753_v63  ;;  %v269_v61 = vsub.s32 0, %v3100_v60  ;;  %v273_v63 = vsub.s32 1, %v3100_v60  ;;  %v2900_v59 = vld [vmem:[#allocation4 + $0x1e0] ss:$8 sps:$4 sm:$0xff]  }
  0xdd   :  { %1447 = vmatprep.subr.bf16.mxu1 %v2758_v0 }
  0xde   :  { %v274_v0 = vrot.slane %v3106_v62, %v273_v63 }
  0xe0   :  { %1448 = vmatpush1.bf16.msra.mxu1 %v2756_v3 }
  0xe1   :  { %1449 = vmatprep.subr.bf16.mxu1 %v2761_v4 }
  0xe4   :  { %1450 = vmatpush1.bf16.msra.mxu1 %v2759_v7 }
  0xe5   :  { %1462 = vmatprep.subr.bf16.mxu1 %v2764_v8 }
  0xe7   :  { %1452 = vmatmul.mubr.bf16.vlgmr.msra.gmra.mrb[4].mxu1 %v3072_v15  ;;  %v2771_v15 = vld [vmem:[#allocation2 + $0x468] ss:$16 sps:$4 sm:$0xff]  }
  0xe8   :  { %1463 = vmatpush1.bf16.msra.mxu1 %v2762_v11  ;;  %1494 = vmatprep.mubr.bf16.mxu1 %v3083_v44  ;;  %v2849_v44 = vld [vmem:[#allocation4 + $0xd0] ss:$8 sps:$4 sm:$0xff]  }
  0xe9   :  { %1464 = vmatprep.subr.bf16.mxu1 %v2767_v13  ;;  %1940 = vmatpush1.bf16.msra.mxu0 %v2849_v44  ;;  %v2866_v44 = vld [vmem:[#allocation4 + $0x124] ss:$8 sps:$4 sm:$0xff]  }
  0xea   :  { %1941 = vmatprep.subr.bf16.mxu0 %v2854_v31  ;;  %v2911_v31 = vld [vmem:[%s3188_s5 + $0x10] sm:$0xff]  }
  0xec   :  { %1465 = vmatpush1.bf16.msra.mxu1 %v2765_v17 }
  0xed   :  { %1466 = vmatprep.subr.bf16.mxu1 %v2770_v18  ;;  %1942 = vmatpush1.bf16.msra.mxu0 %v2852_v12  ;;  %v2867_v12 = vld [vmem:[#allocation4 + $0x130] ss:$8 sps:$4 sm:$0xff]  }
  0xee   :  { %1943 = vmatprep.subr.bf16.mxu0 %v2857_v34  ;;  %v2913_v34 = vld [vmem:[%s3188_s5 + $0x18] sm:$0xff]  }
  0xf0   :  { %1467 = vmatpush1.bf16.msra.mxu1 %v2768_v22  ;;  %v2858_v22 = vld [vmem:[#allocation4 + $0x100] ss:$8 sps:$4 sm:$0xff]  }
  0xf1   :  { %1468 = vmatprep.subr.bf16.mxu1 %v2773_v23  ;;  %1944 = vmatpush1.bf16.msra.mxu0 %v2855_v35  ;;  %v2863_v23 = vld [vmem:[#allocation4 + $0x114] ss:$8 sps:$4 sm:$0xff]   ;;  %v2870_v35 = vld [vmem:[#allocation4 + $0x140] ss:$8 sps:$4 sm:$0xff]  }
  0xf2   :  { %1956 = vmatprep.subr.bf16.mxu0 %v2860_v39  ;;  %v2873_v39 = vld [vmem:[#allocation4 + $0x150] ss:$8 sps:$4 sm:$0xff]  }
  0xf4   :  { %1469 = vmatpush1.bf16.msra.mxu1 %v2771_v15  ;;  %v2908_v15 = vld [vmem:[%s3188_s5 + $0x48] sm:$0xff]  }
  0xf5   :  { %1470 = vmatprep.subr.bf16.mxu1 %v2776_v26  ;;  %v2861_v26 = vld [vmem:[#allocation4 + $0x110] ss:$8 sps:$4 sm:$0xff]  }
  0xf8   :  { %1471 = vmatpush1.bf16.msra.mxu1 %v2774_v27  ;;  %v2909_v27 = vld [vmem:[%s3188_s5 + $0x8] sm:$0xff]  }
  0xf9   :  { %1472 = vmatprep.subr.bf16.mxu1 %v2779_v28  ;;  %v2910_v28 = vld [vmem:[%s3188_s5 + $0x50] sm:$0xff]  }
  0xfc   :  { %1473 = vmatpush1.bf16.msra.mxu1 %v2777_v29  ;;  %v2864_v29 = vld [vmem:[#allocation4 + $0x120] ss:$8 sps:$4 sm:$0xff]  }
  0xfd   :  { %1474 = vmatprep.subr.bf16.mxu1 %v2782_v30  ;;  %v2869_v30 = vld [vmem:[#allocation4 + $0x134] ss:$8 sps:$4 sm:$0xff]  }
 0x100   :  { %1475 = vmatpush1.bf16.msra.mxu1 %v2780_v32  ;;  %v2912_v32 = vld [vmem:[%s3188_s5 + $0x58] sm:$0xff]  }
 0x101   :  { %1476 = vmatprep.subr.bf16.mxu1 %v2785_v33  ;;  %v2872_v33 = vld [vmem:[#allocation4 + $0x144] ss:$8 sps:$4 sm:$0xff]  }
 0x104   :  { %1477 = vmatpush1.bf16.msra.mxu1 %v2783_v55  ;;  %v2914_v55 = vld [vmem:[%s3188_s5 + $0x60] sm:$0xff]  }
 0x105   :  { %1478 = vmatprep.subr.bf16.mxu1 %v2788_v36  ;;  %v2875_v36 = vld [vmem:[#allocation4 + $0x154] ss:$8 sps:$4 sm:$0xff]  }
 0x108   :  { %1479 = vmatpush1.bf16.msra.mxu1 %v2786_v37  ;;  %v2915_v37 = vld [vmem:[%s3188_s5 + $0x20] sm:$0xff]  }
 0x109   :  { %1480 = vmatprep.subr.bf16.mxu1 %v2791_v38  ;;  %v2916_v38 = vld [vmem:[%s3188_s5 + $0x68] sm:$0xff]  }
 0x10c   :  { %1481 = vmatpush1.bf16.msra.mxu1 %v2789_v40  ;;  %v2878_v40 = vld [vmem:[#allocation4 + $0x164] ss:$8 sps:$4 sm:$0xff]  }
 0x10d   :  { %1482 = vmatprep.subr.bf16.mxu1 %v2794_v41  ;;  %v2876_v41 = vld [vmem:[#allocation4 + $0x160] ss:$8 sps:$4 sm:$0xff]  }
 0x110   :  { %1483 = vmatpush1.bf16.msra.mxu1 %v2792_v42  ;;  %v2881_v42 = vld [vmem:[#allocation4 + $0x174] ss:$8 sps:$4 sm:$0xff]  }
 0x111   :  { %1484 = vmatprep.subr.bf16.mxu1 %v2797_v43  ;;  %v2879_v43 = vld [vmem:[#allocation4 + $0x170] ss:$8 sps:$4 sm:$0xff]  }
 0x114   :  { %1485 = vmatpush1.bf16.msra.mxu1 %v2795_v45  ;;  %v2884_v45 = vld [vmem:[#allocation4 + $0x184] ss:$8 sps:$4 sm:$0xff]  }
 0x115   :  { %1486 = vmatprep.subr.bf16.mxu1 %v2800_v46  ;;  %v2882_v46 = vld [vmem:[#allocation4 + $0x180] ss:$8 sps:$4 sm:$0xff]  }
 0x118   :  { %1487 = vmatpush1.bf16.msra.mxu1 %v2798_v47  ;;  %v2887_v47 = vld [vmem:[#allocation4 + $0x194] ss:$8 sps:$4 sm:$0xff]  }
 0x119   :  { %1488 = vmatprep.subr.bf16.mxu1 %v2803_v48  ;;  %v2885_v48 = vld [vmem:[#allocation4 + $0x190] ss:$8 sps:$4 sm:$0xff]  }
 0x11c   :  { %1489 = vmatpush1.bf16.msra.mxu1 %v2801_v49  ;;  %v2890_v49 = vld [vmem:[#allocation4 + $0x1a4] ss:$8 sps:$4 sm:$0xff]  }
 0x11d   :  { %1490 = vmatprep.subr.bf16.mxu1 %v2806_v50  ;;  %v2888_v50 = vld [vmem:[#allocation4 + $0x1a0] ss:$8 sps:$4 sm:$0xff]  }
 0x120   :  { %1491 = vmatpush1.bf16.msra.mxu1 %v2804_v51  ;;  %v2893_v51 = vld [vmem:[#allocation4 + $0x1b4] ss:$8 sps:$4 sm:$0xff]  }
 0x121   :  { %1492 = vmatprep.subr.bf16.mxu1 %v2809_v52  ;;  %v2891_v52 = vld [vmem:[#allocation4 + $0x1b0] ss:$8 sps:$4 sm:$0xff]  }
 0x124   :  { %1493 = vmatpush1.bf16.msra.mxu1 %v2807_v53  ;;  %v2896_v53 = vld [vmem:[#allocation4 + $0x1c4] ss:$8 sps:$4 sm:$0xff]  }
 0x125   :  { %2462 = vmatprep.subr.bf16.mxu1 %v2906_v24  ;;  %v2920_v24 = vld [vmem:[%s3188_s5 + $0x78] sm:$0xff]  }
 0x127   :  { %1495 = vmatmul.mubr.bf16.vlgmr.msra.gmra.mrb[4].mxu1 %v3092_v21  ;;  %v270_v21 = vrot.slane %v3106_v62, %v269_v61 }
 0x128   :  { %2463 = vmatpush3.bf16.msra.mxu1 %v2907_v25  ;;  %v2921_v25 = vld [vmem:[%s3188_s5 + $0x38] sm:$0xff]  }
 0x129   :  { %2464 = vmatprep.subr.bf16.mxu1 %v2908_v15  ;;  %v1581_v15 = vld [vmem:[%s3187_s4] sm:$0x3] }
 0x12c   :  { %2465 = vmatpush3.bf16.msra.mxu1 %v2909_v27 }
 0x12d   :  { %2466 = vmatprep.subr.bf16.mxu1 %v2910_v28 }
 0x130   :  { %2467 = vmatpush3.bf16.msra.mxu1 %v2911_v31 }
 0x131   :  { %2468 = vmatprep.subr.bf16.mxu1 %v2912_v32 }
 0x134   :  { %2469 = vmatpush3.bf16.msra.mxu1 %v2913_v34 }
 0x135   :  { %2470 = vmatprep.subr.bf16.mxu1 %v2914_v55 }
 0x138   :  { %2471 = vmatpush3.bf16.msra.mxu1 %v2915_v37 }
 0x139   :  { %2472 = vmatprep.subr.bf16.mxu1 %v2916_v38 }
 0x13a   :  { %v1281_v54 = vpop.f32.mrb[0].mxu1 }
 0x13b   :  { %v1283_v56 = vpop.f32.mrb[1].mxu1  ;;  %v1282_v1 = vadd.f32 %v1281_v54, %v270_v21  ;;  %v2894_v54 = vld [vmem:[#allocation4 + $0x1c0] ss:$8 sps:$4 sm:$0xff]  }
 0x13c   :  { %v1285_v57 = vpop.f32.mrb[2].mxu1  ;;  %v1284_v2 = vadd.f32 %v1283_v56, %v274_v0  ;;  %v2899_v56 = vld [vmem:[#allocation4 + $0x1d4] ss:$8 sps:$4 sm:$0xff]  }
 0x13d   :  { %v1287_v58 = vpop.f32.mrb[3].mxu1  ;;  %v1286_v4 = vadd.f32 %v1285_v57, %v270_v21  ;;  %v2897_v57 = vld [vmem:[#allocation4 + $0x1d0] ss:$8 sps:$4 sm:$0xff]   ;;  %v2905_v21 = vld [vmem:[#allocation4 + $0x1f4] ss:$8 sps:$4 sm:$0xff]  }
 0x13e   :  { %v1288_v7 = vadd.f32 %v1287_v58, %v274_v0  ;;  %v2902_v58 = vld [vmem:[#allocation4 + $0x1e4] ss:$8 sps:$4 sm:$0xff]   ;;  %v2903_v0 = vld [vmem:[#allocation4 + $0x1f0] ss:$8 sps:$4 sm:$0xff]  }
 0x17b   :  { %v1367_v3 = vpop.f32.mrb[0].mxu0 }
 0x17c   :  { %v2485_v5 = vadd.f32 %v1367_v3, %v1282_v1  ;;  %v1369_v6 = vpop.f32.mrb[1].mxu0  ;;  %v277_v1 = vsub.s32 2, %v3100_v60 }
 0x17d   :  { %v2487_v8 = vadd.f32 %v1369_v6, %v1284_v2  ;;  %v1371_v9 = vpop.f32.mrb[2].mxu0  ;;  %v281_v2 = vsub.s32 3, %v3100_v60  ;;  %v2445_v60 = vld [vmem:[%s3189_s6] ss:$0 sm:$0xff] }
 0x17e   :  { %v2489_v10 = vadd.f32 %v1371_v9, %v1286_v4  ;;  %v1373_v11 = vpop.f32.mrb[3].mxu0  ;;  %v1505_v14 = vmax.f32 %v2485_v5, 0.0  ;;  %v278_v3 = vrot.slane %v3106_v62, %v277_v1 }
 0x17f   :  { %v2491_v13 = vadd.f32 %v1373_v11, %v1288_v7  ;;  %v1506_v17 = vmax.f32 %v2487_v8, 0.0  ;;  %v282_v4 = vrot.slane %v3106_v62, %v281_v2  ;;  %v2917_v62 = vld [vmem:[%s3188_s5 + $0x28] sm:$0xff]  }
 0x180   :  { %v1509_v16 = vmax.f32 %v2489_v10, 0.0  ;;  %2473 = vmatpush3.bf16.msra.mxu1 %v2917_v62 }
 0x181   :  { %v1510_v18 = vmax.f32 %v2491_v13, 0.0 }
 0x182   :  { %v1513_v19 = vpack.c.bf16 %v1509_v16, %v1505_v14 }
 0x183   :  { %v1514_v20 = vpack.c.bf16 %v1510_v18, %v1506_v17 }
 0x185   :  { %1945 = vmatprep.mubr.bf16.mxu0 %v1514_v20 }
 0x186   :  { %1946 = vmatmul.mubr.bf16.vlgmr.msra.gmra.mrb[4].mxu0 %v1513_v19 }
 0x187   :  { %1957 = vmatpush1.bf16.msra.mxu0 %v2858_v22  ;;  %v2918_v22 = vld [vmem:[%s3188_s5 + $0x70] sm:$0xff]  }
 0x188   :  { %1958 = vmatprep.subr.bf16.mxu0 %v2863_v23  ;;  %v2919_v23 = vld [vmem:[%s3188_s5 + $0x30] sm:$0xff]   ;;  %2474 = vmatprep.subr.bf16.mxu1 %v2918_v22 }
 0x189   :  { %2475 = vmatpush3.bf16.msra.mxu1 %v2919_v23 }
 0x18a   :  { %2476 = vmatprep.subr.bf16.mxu1 %v2920_v24 }
 0x18b   :  { %1959 = vmatpush1.bf16.msra.mxu0 %v2861_v26  ;;  %v1586_v26 = vrot.slane %v1581_v15, %v269_v61 }
 0x18c   :  { %1960 = vmatprep.subr.bf16.mxu0 %v2866_v44  ;;  %v1590_v44 = vrot.slane %v1581_v15, %v273_v63 }
 0x18d   :  { %2477 = vmatpush3.bf16.msra.mxu1 %v2921_v25 }
 0x18f   :  { %1961 = vmatpush1.bf16.msra.mxu0 %v2864_v29 }
 0x190   :  { %1962 = vmatprep.subr.bf16.mxu0 %v2869_v30 }
 0x193   :  { %1963 = vmatpush1.bf16.msra.mxu0 %v2867_v12 }
 0x194   :  { %1964 = vmatprep.subr.bf16.mxu0 %v2872_v33 }
 0x197   :  { %1965 = vmatpush1.bf16.msra.mxu0 %v2870_v35 }
 0x198   :  { %1966 = vmatprep.subr.bf16.mxu0 %v2875_v36 }
 0x19b   :  { %1967 = vmatpush1.bf16.msra.mxu0 %v2873_v39 }
 0x19c   :  { %1968 = vmatprep.subr.bf16.mxu0 %v2878_v40 }
 0x19f   :  { %1969 = vmatpush1.bf16.msra.mxu0 %v2876_v41 }
 0x1a0   :  { %1970 = vmatprep.subr.bf16.mxu0 %v2881_v42 }
 0x1a3   :  { %1971 = vmatpush1.bf16.msra.mxu0 %v2879_v43 }
 0x1a4   :  { %1972 = vmatprep.subr.bf16.mxu0 %v2884_v45 }
 0x1a7   :  { %1973 = vmatpush1.bf16.msra.mxu0 %v2882_v46 }
 0x1a8   :  { %1974 = vmatprep.subr.bf16.mxu0 %v2887_v47 }
 0x1ab   :  { %1975 = vmatpush1.bf16.msra.mxu0 %v2885_v48 }
 0x1ac   :  { %1976 = vmatprep.subr.bf16.mxu0 %v2890_v49 }
 0x1af   :  { %1977 = vmatpush1.bf16.msra.mxu0 %v2888_v50 }
 0x1b0   :  { %1978 = vmatprep.subr.bf16.mxu0 %v2893_v51 }
 0x1b3   :  { %1979 = vmatpush1.bf16.msra.mxu0 %v2891_v52 }
 0x1b4   :  { %1980 = vmatprep.subr.bf16.mxu0 %v2896_v53 }
 0x1b7   :  { %1981 = vmatpush1.bf16.msra.mxu0 %v2894_v54 }
 0x1b8   :  { %1982 = vmatprep.subr.bf16.mxu0 %v2899_v56 }
 0x1bb   :  { %1983 = vmatpush1.bf16.msra.mxu0 %v2897_v57 }
 0x1bc   :  { %1984 = vmatprep.subr.bf16.mxu0 %v2902_v58 }
 0x1bf   :  { %1985 = vmatpush1.bf16.msra.mxu0 %v2900_v59 }
 0x1c0   :  { %1986 = vmatprep.subr.bf16.mxu0 %v2905_v21 }
 0x1c3   :  { %1987 = vmatpush1.bf16.msra.mxu0 %v2903_v0 }
 0x1fa   :  { %v1496_v5 = vpop.f32.mrb[4].mxu1 }
 0x1fb   :  { %v2492_v6 = vadd.f32 %v1496_v5, %v278_v3  ;;  %v1498_v7 = vpop.f32.mrb[5].mxu1 }
 0x1fc   :  { %v2493_v8 = vadd.f32 %v1498_v7, %v282_v4  ;;  %v1500_v9 = vpop.f32.mrb[6].mxu1 }
 0x1fd   :  { %v2494_v10 = vadd.f32 %v1500_v9, %v278_v3  ;;  %v1502_v11 = vpop.f32.mrb[7].mxu1  ;;  %v1507_v14 = vmax.f32 %v2492_v6, 0.0 }
 0x1fe   :  { %v2495_v13 = vadd.f32 %v1502_v11, %v282_v4  ;;  %v1508_v17 = vmax.f32 %v2493_v8, 0.0 }
 0x1ff   :  { %v1511_v16 = vmax.f32 %v2494_v10, 0.0 }
 0x200   :  { %v1512_v18 = vmax.f32 %v2495_v13, 0.0 }
 0x201   :  { %v1515_v19 = vpack.c.bf16 %v1511_v16, %v1507_v14 }
 0x202   :  { %v1516_v20 = vpack.c.bf16 %v1512_v18, %v1508_v17 }
 0x204   :  { %1988 = vmatprep.mubr.bf16.mxu0 %v1516_v20 }
 0x205   :  { %1989 = vmatmul.mubr.bf16.vlgmr.msra.gmra.mrb[4].mxu0 %v1515_v19 }
 0x2d8   :  { %v1990_v27 = vpop.f32.mrb[4].mxu0 }
 0x2d9   :  { %v2496_v28 = vadd.f32 %v1990_v27, %v1586_v26  ;;  %v1992_v29 = vpop.f32.mrb[5].mxu0 }
 0x2da   :  { %v2497_v30 = vadd.f32 %v1992_v29, %v1590_v44  ;;  %v1994_v31 = vpop.f32.mrb[6].mxu0 }
 0x2db   :  { %v2498_v32 = vadd.f32 %v1994_v31, %v1586_v26  ;;  %v1996_v12 = vpop.f32.mrb[7].mxu0  ;;  %v1999_v34 = vmax.f32 %v2496_v28, 0.0 }
 0x2dc   :  { %v2499_v33 = vadd.f32 %v1996_v12, %v1590_v44  ;;  %v2000_v35 = vmax.f32 %v2497_v30, 0.0 }
 0x2dd   :  { %v2001_v55 = vmax.f32 %v2498_v32, 0.0 }
 0x2de   :  { %v2002_v36 = vmax.f32 %v2499_v33, 0.0 }
 0x2df   :  { %v2003_v37 = vpack.c.bf16 %v2001_v55, %v1999_v34 }
 0x2e0   :  { %v2004_v38 = vpack.c.bf16 %v2002_v36, %v2000_v35 }
 0x2e2   :  { %2172 = vmatprep.mubr.bf16.mxu1 %v2004_v38 }
 0x2e3   :  { %2173 = vmatmul.mubr.bf16.vlgmr.msra.gmra.mrb[8].mxu1 %v2003_v37 }
 0x3b6   :  { %v2478_v61 = vpop.f32.mrb[8].mxu1 }
 0x3b7   :  { %v2479_v63 = vpop.f32.mrb[9].mxu1 }
 0x3b8   :  { %v2480_v39 = vadd.f32 %v2479_v63, %v2478_v61  ;;  %v2481_v40 = vpop.f32.mrb[10].mxu1 }
 0x3b9   :  { %v2482_v41 = vpop.f32.mrb[11].mxu1 }
 0x3ba   :  { %v2175_v42 = vadd.f32 %v2480_v39, %v2445_v60  ;;  %v2483_v43 = vadd.f32 %v2482_v41, %v2481_v40 }
 0x3bc   :  { %2181 = vst [vmem:[%s3190_s7] sm:$0xff] %v2175_v42  ;;  %v2178_v45 = vadd.f32 %v2483_v43, %v2445_v60 }
 0x3be   :  { %2182 = vst [vmem:[%s3190_s7 + $0x8] sm:$0xff] %v2178_v45 }
 0x3bf   :  { %2187 = vsyncpa [#allocation3], 1 }
 0x3c0   :  { %2188 = vsyncpa [#allocation5], 1 }

</bundles_post_ra>
